<compile_context>
chip_gen: v7x
topology: tpu7x:2x2x1
jax: 0.10.0
libtpu: 0.0.40
codegen_flags: <defaults>
</compile_context>

<pallas_src>
import jax
import jax.numpy as jnp
from jax.experimental import pallas as pl
from jax.experimental.pallas import tpu as pltpu


def _semantic_fmri_kernel(h1_ref, h2_ref, w3_ref, b3_ref, wa_ref, ba_ref,
                          graph_ref, coef_ref):
    # Per grid step (cb = classes handled this step):
    #   h1_ref   : (M, D)        f32   precomputed img_features @ W1 (M = B*T)
    #   h2_ref   : (cb, D)       f32   precomputed word_features @ W2 block
    #   w3_ref   : (D, D)        bf16
    #   b3_ref   : (1, D)        f32
    #   wa_ref   : (D, V)        bf16
    #   ba_ref   : (1, V)        f32
    #   graph_ref: (B, cb, V)    f32   module-layout output block
    #   coef_ref : (B, T, cb, V) f32   module-layout output block
    M, _D = h1_ref.shape
    cb = h2_ref.shape[0]
    B = graph_ref.shape[0]
    T = M // B
    V = wa_ref.shape[1]

    h1 = h1_ref[...]                                                       # (M, D)
    h2 = h2_ref[...]                                                       # (cb, D)

    # Class-major (class, batch, time) row order keeps every intermediate
    # sublane/lane dense (M is a multiple of 8, T == 8 -> native tiles).
    prod = jnp.tanh(h1[None, :, :] * h2[:, None, :])                       # (cb, M, D)
    prod2 = prod.reshape(cb * M, h1.shape[1]).astype(jnp.bfloat16)

    # fc_3_f (with bias): (cb*M, D) @ (D, D) + b3.  bf16 MXU inputs, f32 acc.
    lb = jnp.dot(prod2, w3_ref[...],
                 preferred_element_type=jnp.float32) + b3_ref[...]         # (cb*M, D)

    # fc_a_f (with bias): (cb*M, D) @ (D, V) + ba
    logits = jnp.dot(lb.astype(jnp.bfloat16), wa_ref[...],
                     preferred_element_type=jnp.float32) + ba_ref[...]     # (cb*M, V)

    # Softmax over the timepoint axis: rows come in contiguous groups of T.
    G = cb * B
    logits3 = logits.reshape(G, T, V)
    m = jnp.max(logits3, axis=1, keepdims=True)
    e = jnp.exp(logits3 - m)
    denom = jnp.sum(e, axis=1, keepdims=True)
    coef3 = e * pl.reciprocal(denom, approx=True)                          # (G, T, V)

    # lb.view(..., T, C, V) * coef, mean over T (as sum * 1/T).
    lb3 = lb.reshape(G, T, V)
    graph2 = jnp.sum(lb3 * coef3, axis=1) * (1.0 / T)                      # (G, V)

    # VMEM relayout (class, batch, time) -> module layout (batch, time, class)
    # via a tiny static per-class strided store; no wrapper HBM transpose.
    for c in range(cb):
        rows = slice(c * B, (c + 1) * B)
        graph_ref[:, pl.ds(c, 1), :] = graph2[rows, :][:, None, :]
        coef_ref[:, :, pl.ds(c, 1), :] = coef3[rows, :, :][:, :, None, :]


def semantic_fmri_forward(img_feature_map, word_features, params,
                          class_block=None):
    """Returns (graph_net_input (B, C, V), coefficient (B, T, C, V))."""
    w1, w2, w3, b3, wa, ba = params
    B, T, V = img_feature_map.shape
    C, _W = word_features.shape
    D = w1.shape[1]
    assert D == V, "module semantics require intermediary_dim == voxel_num"

    # Default: single grid step (all classes at once).  The grid is a serial
    # loop on v5e/v6e, and one step maximises the MXU M dimension.  For v7x
    # megacore pass class_block = C // 2 (must be a multiple of 8 so the
    # class-blocked output tiles stay (8,128)-legal).
    cb = C if class_block is None else class_block
    assert C % cb == 0, "class_block must divide num_classes"
    assert cb == C or cb % 8 == 0, \
        "class blocks must be a multiple of 8 (or the full class dim)"
    n_steps = C // cb
    M = B * T

    # Hoisted, grid-invariant matmuls (each computed exactly once):
    h1 = jnp.dot(img_feature_map.reshape(M, V), w1,
                 preferred_element_type=jnp.float32)                       # (M, D)
    h2 = jnp.dot(word_features, w2,
                 preferred_element_type=jnp.float32)                       # (C, D)

    # bf16 weights for the MXU; biases stay f32.
    w3_b = w3.astype(jnp.bfloat16)
    wa_b = wa.astype(jnp.bfloat16)
    b3_2d = b3.reshape(1, D).astype(jnp.float32)
    ba_2d = ba.reshape(1, V).astype(jnp.float32)

    in_specs = [
        pl.BlockSpec((M, D), lambda i: (0, 0)),        # h1 (full)
        pl.BlockSpec((cb, D), lambda i: (i, 0)),       # h2 class block
        pl.BlockSpec((D, D), lambda i: (0, 0)),        # w3
        pl.BlockSpec((1, D), lambda i: (0, 0)),        # b3
        pl.BlockSpec((D, V), lambda i: (0, 0)),        # wa
        pl.BlockSpec((1, V), lambda i: (0, 0)),        # ba
    ]
    out_specs = [
        pl.BlockSpec((B, cb, V), lambda i: (0, i, 0)),       # graph, module layout
        pl.BlockSpec((B, T, cb, V), lambda i: (0, 0, i, 0)),  # coef, module layout
    ]
    out_shape = (
        jax.ShapeDtypeStruct((B, C, V), jnp.float32),
        jax.ShapeDtypeStruct((B, T, C, V), jnp.float32),
    )

    # Corrected cost model: weights/biases DMA'd once; no in-kernel h1 matmul.
    flops = 2 * (C * M) * D * D + 2 * (C * M) * D * V
    transcendentals = C * M * D + C * M * V              # tanh + exp
    bytes_accessed = (h1.size * 4 + h2.size * 4
                      + (w3_b.size + wa_b.size) * 2
                      + (b3_2d.size + ba_2d.size) * 4
                      + (B * C * V + B * T * C * V) * 4)

    graph_net_input, coefficient = pl.pallas_call(
        _semantic_fmri_kernel,
        out_shape=out_shape,
        grid_spec=pl.GridSpec(grid=(n_steps,),
                              in_specs=in_specs,
                              out_specs=out_specs),
        compiler_params=pltpu.CompilerParams(
            dimension_semantics=("parallel",)),
        cost_estimate=pl.CostEstimate(flops=flops,
                                      transcendentals=transcendentals,
                                      bytes_accessed=bytes_accessed),
    )(h1, h2, w3_b, b3_2d, wa_b, ba_2d)

    return graph_net_input, coefficient


def reference_forward(img_feature_map, word_features, params):
    """Pure-JAX f32 reference mirroring the PyTorch forward (dropout = identity)."""
    w1, w2, w3, b3, wa, ba = params
    B, T, V = img_feature_map.shape
    C, _ = word_features.shape
    D = w1.shape[1]

    x = img_feature_map.reshape(B * T, V)
    f_wh = (x @ w1)[:, None, :].repeat(C, axis=1)                  # (B*T, C, D)
    f_wd = (word_features @ w2)[None, :, :].repeat(B * T, axis=0)  # (B*T, C, D)
    lb = jnp.tanh(f_wh * f_wd).reshape(-1, D) @ w3 + b3            # (B*T*C, D)
    logits = lb @ wa + ba                                          # (B*T*C, V)
    coef = logits.reshape(B, T, C, V).transpose(0, 2, 1, 3)        # (B, C, T, V)
    coef = jax.nn.softmax(coef, axis=2)
    coef = coef.transpose(0, 2, 1, 3)                              # (B, T, C, V)
    fmap = lb.reshape(B, T, C, V) * coef
    return jnp.mean(fmap, axis=1), coef


if __name__ == "__main__":
    # Small shapes consistent with the module:
    B = 2            # batch_size
    T = 8            # timepoints_num
    C = 4            # num_classes
    W = 32           # word_feature_dim
    V = 128          # voxel_num
    D = 128          # intermediary_dim (must equal voxel_num, see note above)

    key = jax.random.PRNGKey(0)
    k_img, k_word, k1, k2, k3, kb3, ka, kba = jax.random.split(key, 8)

    img_feature_map = jax.random.normal(k_img, (B, T, V), dtype=jnp.float32)
    word_features = jax.random.normal(k_word, (C, W), dtype=jnp.float32)

    params = (
        jax.random.normal(k1, (V, D), dtype=jnp.float32) * 0.05,   # fc_1_f
        jax.random.normal(k2, (W, D), dtype=jnp.float32) * 0.05,   # fc_2_f
        jax.random.normal(k3, (D, D), dtype=jnp.float32) * 0.05,   # fc_3_f weight
        jax.random.normal(kb3, (D,), dtype=jnp.float32) * 0.05,    # fc_3_f bias
        jax.random.normal(ka, (D, V), dtype=jnp.float32) * 0.05,   # fc_a_f weight
        jax.random.normal(kba, (V,), dtype=jnp.float32) * 0.05,    # fc_a_f bias
    )

    graph_out, coef_out = semantic_fmri_forward(img_feature_map, word_features, params)
    jax.block_until_ready((graph_out, coef_out))

    graph_ref, coef_ref = reference_forward(img_feature_map, word_features, params)
    assert graph_out.shape == (B, C, V)
    assert coef_out.shape == (B, T, C, V)
    # bf16 MXU inputs + approx reciprocal -> looser tolerance vs f32 reference.
    assert jnp.allclose(graph_out, graph_ref, atol=2e-2, rtol=2e-2)
    assert jnp.allclose(coef_out, coef_ref, atol=2e-2, rtol=2e-2)

    print("KERNEL_OK")
</pallas_src>

<mosaic_0001>
module attributes {stable_mosaic.version = 11 : i64} {
  func.func @_semantic_fmri_kernel(%arg0: i32, %arg1: memref<16x128xf32, #tpu.memory_space<vmem>>, %arg2: memref<4x128xf32, #tpu.memory_space<vmem>>, %arg3: memref<128x128xbf16, #tpu.memory_space<vmem>>, %arg4: memref<1x128xf32, #tpu.memory_space<vmem>>, %arg5: memref<128x128xbf16, #tpu.memory_space<vmem>>, %arg6: memref<1x128xf32, #tpu.memory_space<vmem>>, %arg7: memref<2x4x128xf32, #tpu.memory_space<vmem>>, %arg8: memref<2x8x4x128xf32, #tpu.memory_space<vmem>>) attributes {dimension_semantics = [#tpu.dimension_semantics<parallel>], iteration_bounds = array<i64: 1>, scalar_prefetch = 0 : i64, scratch_operands = 0 : i64, tpu.core_type = #tpu.core_type<tc>, window_params = [{pipeline_mode = #tpu.pipeline_mode<synchronous>, transform_indices = @transform_0, window_bounds = array<i64: 16, 128>}, {transform_indices = @transform_1, window_bounds = array<i64: 4, 128>}, {pipeline_mode = #tpu.pipeline_mode<synchronous>, transform_indices = @transform_2, window_bounds = array<i64: 128, 128>}, {pipeline_mode = #tpu.pipeline_mode<synchronous>, transform_indices = @transform_3, window_bounds = array<i64: 1, 128>}, {pipeline_mode = #tpu.pipeline_mode<synchronous>, transform_indices = @transform_4, window_bounds = array<i64: 128, 128>}, {pipeline_mode = #tpu.pipeline_mode<synchronous>, transform_indices = @transform_5, window_bounds = array<i64: 1, 128>}, {transform_indices = @transform_6, window_bounds = array<i64: 2, 4, 128>}, {transform_indices = @transform_7, window_bounds = array<i64: 2, 8, 4, 128>}]} {
    %c0 = arith.constant 0 : index
    %c0_0 = arith.constant 0 : index
    %0 = vector.load %arg1[%c0, %c0_0] : memref<16x128xf32, #tpu.memory_space<vmem>>, vector<16x128xf32>
    %c0_1 = arith.constant 0 : index
    %c0_2 = arith.constant 0 : index
    %1 = vector.load %arg2[%c0_1, %c0_2] : memref<4x128xf32, #tpu.memory_space<vmem>>, vector<4x128xf32>
    %2 = vector.shape_cast %0 : vector<16x128xf32> to vector<1x16x128xf32>
    %3 = vector.shape_cast %1 : vector<4x128xf32> to vector<4x1x128xf32>
    %4 = vector.broadcast %2 : vector<1x16x128xf32> to vector<4x16x128xf32>
    %5 = vector.broadcast %3 : vector<4x1x128xf32> to vector<4x16x128xf32>
    %6 = arith.mulf %4, %5 : vector<4x16x128xf32>
    %7 = math.tanh %6 : vector<4x16x128xf32>
    %8 = vector.shape_cast %7 : vector<4x16x128xf32> to vector<64x128xf32>
    %9 = arith.truncf %8 : vector<64x128xf32> to vector<64x128xbf16>
    %c0_3 = arith.constant 0 : index
    %c0_4 = arith.constant 0 : index
    %10 = vector.load %arg3[%c0_3, %c0_4] : memref<128x128xbf16, #tpu.memory_space<vmem>>, vector<128x128xbf16>
    %cst = arith.constant dense<0.000000e+00> : vector<64x128xf32>
    %11 = tpu.matmul %9, %10, %cst {dimension_numbers = #tpu.dot_dimension_numbers<[1], [0], [0], [1], [0, 0, 1, 1], [], []>} : vector<64x128xbf16>, vector<128x128xbf16>, vector<64x128xf32> -> vector<64x128xf32>
    %c0_5 = arith.constant 0 : index
    %c0_6 = arith.constant 0 : index
    %12 = vector.load %arg4[%c0_5, %c0_6] : memref<1x128xf32, #tpu.memory_space<vmem>>, vector<1x128xf32>
    %13 = vector.broadcast %12 : vector<1x128xf32> to vector<64x128xf32>
    %14 = arith.addf %11, %13 : vector<64x128xf32>
    %15 = arith.truncf %14 : vector<64x128xf32> to vector<64x128xbf16>
    %c0_7 = arith.constant 0 : index
    %c0_8 = arith.constant 0 : index
    %16 = vector.load %arg5[%c0_7, %c0_8] : memref<128x128xbf16, #tpu.memory_space<vmem>>, vector<128x128xbf16>
    %cst_9 = arith.constant dense<0.000000e+00> : vector<64x128xf32>
    %17 = tpu.matmul %15, %16, %cst_9 {dimension_numbers = #tpu.dot_dimension_numbers<[1], [0], [0], [1], [0, 0, 1, 1], [], []>} : vector<64x128xbf16>, vector<128x128xbf16>, vector<64x128xf32> -> vector<64x128xf32>
    %c0_10 = arith.constant 0 : index
    %c0_11 = arith.constant 0 : index
    %18 = vector.load %arg6[%c0_10, %c0_11] : memref<1x128xf32, #tpu.memory_space<vmem>>, vector<1x128xf32>
    %19 = vector.broadcast %18 : vector<1x128xf32> to vector<64x128xf32>
    %20 = arith.addf %17, %19 : vector<64x128xf32>
    %21 = vector.shape_cast %20 : vector<64x128xf32> to vector<8x8x128xf32>
    %cst_12 = arith.constant dense<0xFF800000> : vector<8x128xf32>
    %22 = vector.multi_reduction <maximumf>, %21, %cst_12 [1] : vector<8x8x128xf32> to vector<8x128xf32>
    %23 = vector.shape_cast %22 : vector<8x128xf32> to vector<8x1x128xf32>
    %24 = vector.broadcast %23 : vector<8x1x128xf32> to vector<8x8x128xf32>
    %25 = arith.subf %21, %24 : vector<8x8x128xf32>
    %26 = math.exp %25 : vector<8x8x128xf32>
    %cst_13 = arith.constant dense<0.000000e+00> : vector<8x128xf32>
    %27 = vector.multi_reduction <add>, %26, %cst_13 [1] : vector<8x8x128xf32> to vector<8x128xf32>
    %28 = vector.shape_cast %27 : vector<8x128xf32> to vector<8x1x128xf32>
    %29 = tpu.reciprocal %28 {approx = true} : vector<8x1x128xf32> -> vector<8x1x128xf32>
    %30 = vector.broadcast %29 : vector<8x1x128xf32> to vector<8x8x128xf32>
    %31 = arith.mulf %26, %30 : vector<8x8x128xf32>
    %32 = vector.shape_cast %14 : vector<64x128xf32> to vector<8x8x128xf32>
    %33 = arith.mulf %32, %31 : vector<8x8x128xf32>
    %cst_14 = arith.constant dense<0.000000e+00> : vector<8x128xf32>
    %34 = vector.multi_reduction <add>, %33, %cst_14 [1] : vector<8x8x128xf32> to vector<8x128xf32>
    %cst_15 = arith.constant 1.250000e-01 : f32
    %35 = vector.broadcast %cst_15 : f32 to vector<8x128xf32>
    %36 = arith.mulf %34, %35 : vector<8x128xf32>
    %37 = vector.extract_strided_slice %36 {offsets = [0, 0], sizes = [2, 128], strides = [1, 1]} : vector<8x128xf32> to vector<2x128xf32>
    %38 = vector.shape_cast %37 : vector<2x128xf32> to vector<2x1x128xf32>
    %c0_16 = arith.constant 0 : index
    %c0_17 = arith.constant 0 : index
    %c0_18 = arith.constant 0 : index
    %39 = vector.load %arg7[%c0_16, %c0_17, %c0_18] : memref<2x4x128xf32, #tpu.memory_space<vmem>>, vector<2x1x128xf32>
    tpu.vector_store %arg7[%c0_16, %c0_17, %c0_18], %38 {strides = array<i32>} : memref<2x4x128xf32, #tpu.memory_space<vmem>>, vector<2x1x128xf32>,
    %40 = vector.extract_strided_slice %31 {offsets = [0, 0, 0], sizes = [2, 8, 128], strides = [1, 1, 1]} : vector<8x8x128xf32> to vector<2x8x128xf32>
    %41 = vector.shape_cast %40 : vector<2x8x128xf32> to vector<2x8x1x128xf32>
    %c0_19 = arith.constant 0 : index
    %c0_20 = arith.constant 0 : index
    %c0_21 = arith.constant 0 : index
    %c0_22 = arith.constant 0 : index
    %42 = vector.load %arg8[%c0_19, %c0_20, %c0_21, %c0_22] : memref<2x8x4x128xf32, #tpu.memory_space<vmem>>, vector<2x8x1x128xf32>
    tpu.vector_store %arg8[%c0_19, %c0_20, %c0_21, %c0_22], %41 {strides = array<i32>} : memref<2x8x4x128xf32, #tpu.memory_space<vmem>>, vector<2x8x1x128xf32>,
    %43 = vector.extract_strided_slice %36 {offsets = [2, 0], sizes = [2, 128], strides = [1, 1]} : vector<8x128xf32> to vector<2x128xf32>
    %44 = vector.shape_cast %43 : vector<2x128xf32> to vector<2x1x128xf32>
    %c0_23 = arith.constant 0 : index
    %c1 = arith.constant 1 : index
    %c0_24 = arith.constant 0 : index
    %45 = vector.load %arg7[%c0_23, %c1, %c0_24] : memref<2x4x128xf32, #tpu.memory_space<vmem>>, vector<2x1x128xf32>
    tpu.vector_store %arg7[%c0_23, %c1, %c0_24], %44 {strides = array<i32>} : memref<2x4x128xf32, #tpu.memory_space<vmem>>, vector<2x1x128xf32>,
    %46 = vector.extract_strided_slice %31 {offsets = [2, 0, 0], sizes = [2, 8, 128], strides = [1, 1, 1]} : vector<8x8x128xf32> to vector<2x8x128xf32>
    %47 = vector.shape_cast %46 : vector<2x8x128xf32> to vector<2x8x1x128xf32>
    %c0_25 = arith.constant 0 : index
    %c0_26 = arith.constant 0 : index
    %c1_27 = arith.constant 1 : index
    %c0_28 = arith.constant 0 : index
    %48 = vector.load %arg8[%c0_25, %c0_26, %c1_27, %c0_28] : memref<2x8x4x128xf32, #tpu.memory_space<vmem>>, vector<2x8x1x128xf32>
    tpu.vector_store %arg8[%c0_25, %c0_26, %c1_27, %c0_28], %47 {strides = array<i32>} : memref<2x8x4x128xf32, #tpu.memory_space<vmem>>, vector<2x8x1x128xf32>,
    %49 = vector.extract_strided_slice %36 {offsets = [4, 0], sizes = [2, 128], strides = [1, 1]} : vector<8x128xf32> to vector<2x128xf32>
    %50 = vector.shape_cast %49 : vector<2x128xf32> to vector<2x1x128xf32>
    %c0_29 = arith.constant 0 : index
    %c2 = arith.constant 2 : index
    %c0_30 = arith.constant 0 : index
    %51 = vector.load %arg7[%c0_29, %c2, %c0_30] : memref<2x4x128xf32, #tpu.memory_space<vmem>>, vector<2x1x128xf32>
    tpu.vector_store %arg7[%c0_29, %c2, %c0_30], %50 {strides = array<i32>} : memref<2x4x128xf32, #tpu.memory_space<vmem>>, vector<2x1x128xf32>,
    %52 = vector.extract_strided_slice %31 {offsets = [4, 0, 0], sizes = [2, 8, 128], strides = [1, 1, 1]} : vector<8x8x128xf32> to vector<2x8x128xf32>
    %53 = vector.shape_cast %52 : vector<2x8x128xf32> to vector<2x8x1x128xf32>
    %c0_31 = arith.constant 0 : index
    %c0_32 = arith.constant 0 : index
    %c2_33 = arith.constant 2 : index
    %c0_34 = arith.constant 0 : index
    %54 = vector.load %arg8[%c0_31, %c0_32, %c2_33, %c0_34] : memref<2x8x4x128xf32, #tpu.memory_space<vmem>>, vector<2x8x1x128xf32>
    tpu.vector_store %arg8[%c0_31, %c0_32, %c2_33, %c0_34], %53 {strides = array<i32>} : memref<2x8x4x128xf32, #tpu.memory_space<vmem>>, vector<2x8x1x128xf32>,
    %55 = vector.extract_strided_slice %36 {offsets = [6, 0], sizes = [2, 128], strides = [1, 1]} : vector<8x128xf32> to vector<2x128xf32>
    %56 = vector.shape_cast %55 : vector<2x128xf32> to vector<2x1x128xf32>
    %c0_35 = arith.constant 0 : index
    %c3 = arith.constant 3 : index
    %c0_36 = arith.constant 0 : index
    %57 = vector.load %arg7[%c0_35, %c3, %c0_36] : memref<2x4x128xf32, #tpu.memory_space<vmem>>, vector<2x1x128xf32>
    tpu.vector_store %arg7[%c0_35, %c3, %c0_36], %56 {strides = array<i32>} : memref<2x4x128xf32, #tpu.memory_space<vmem>>, vector<2x1x128xf32>,
    %58 = vector.extract_strided_slice %31 {offsets = [6, 0, 0], sizes = [2, 8, 128], strides = [1, 1, 1]} : vector<8x8x128xf32> to vector<2x8x128xf32>
    %59 = vector.shape_cast %58 : vector<2x8x128xf32> to vector<2x8x1x128xf32>
    %c0_37 = arith.constant 0 : index
    %c0_38 = arith.constant 0 : index
    %c3_39 = arith.constant 3 : index
    %c0_40 = arith.constant 0 : index
    %60 = vector.load %arg8[%c0_37, %c0_38, %c3_39, %c0_40] : memref<2x8x4x128xf32, #tpu.memory_space<vmem>>, vector<2x8x1x128xf32>
    tpu.vector_store %arg8[%c0_37, %c0_38, %c3_39, %c0_40], %59 {strides = array<i32>} : memref<2x8x4x128xf32, #tpu.memory_space<vmem>>, vector<2x8x1x128xf32>,
    return
  }
  func.func @transform_0(%arg0: i32) -> (i32, i32) {
    %c0_i32 = arith.constant 0 : i32
    %c0_i32_0 = arith.constant 0 : i32
    %c0_i32_1 = arith.constant 0 : i32
    return %c0_i32, %c0_i32_0 : i32, i32
  }
  func.func @transform_1(%arg0: i32) -> (i32, i32) {
    %c0_i32 = arith.constant 0 : i32
    %c0_i32_0 = arith.constant 0 : i32
    return %arg0, %c0_i32 : i32, i32
  }
  func.func @transform_2(%arg0: i32) -> (i32, i32) {
    %c0_i32 = arith.constant 0 : i32
    %c0_i32_0 = arith.constant 0 : i32
    %c0_i32_1 = arith.constant 0 : i32
    return %c0_i32, %c0_i32_0 : i32, i32
  }
  func.func @transform_3(%arg0: i32) -> (i32, i32) {
    %c0_i32 = arith.constant 0 : i32
    %c0_i32_0 = arith.constant 0 : i32
    %c0_i32_1 = arith.constant 0 : i32
    return %c0_i32, %c0_i32_0 : i32, i32
  }
  func.func @transform_4(%arg0: i32) -> (i32, i32) {
    %c0_i32 = arith.constant 0 : i32
    %c0_i32_0 = arith.constant 0 : i32
    %c0_i32_1 = arith.constant 0 : i32
    return %c0_i32, %c0_i32_0 : i32, i32
  }
  func.func @transform_5(%arg0: i32) -> (i32, i32) {
    %c0_i32 = arith.constant 0 : i32
    %c0_i32_0 = arith.constant 0 : i32
    %c0_i32_1 = arith.constant 0 : i32
    return %c0_i32, %c0_i32_0 : i32, i32
  }
  func.func @transform_6(%arg0: i32) -> (i32, i32, i32) {
    %c0_i32 = arith.constant 0 : i32
    %c0_i32_0 = arith.constant 0 : i32
    %c0_i32_1 = arith.constant 0 : i32
    return %c0_i32, %arg0, %c0_i32_0 : i32, i32, i32
  }
  func.func @transform_7(%arg0: i32) -> (i32, i32, i32, i32) {
    %c0_i32 = arith.constant 0 : i32
    %c0_i32_0 = arith.constant 0 : i32
    %c0_i32_1 = arith.constant 0 : i32
    %c0_i32_2 = arith.constant 0 : i32
    return %c0_i32, %c0_i32_0, %arg0, %c0_i32_1 : i32, i32, i32, i32
  }
}

</mosaic_0001>

<bundles_post_ra>
// kernel: tpu_custom_call.1
= control target key start
LH: loop header
LB: loop body
LE: loop exit
PB: predicated region body
PF: predicated region fallthrough
CT: control target
= control target key end

     0   :  { %13 = vsyncpa [#allocation3], 0  ;;  %s1853_s0 = inlined_call_operand.hbm [shape: f32[16,128], index: 0, kind: input, shape index: {}]   ;;  %s1854_s1 = inlined_call_operand.hbm [shape: f32[4,128], index: 1, kind: input, shape index: {}]   ;;  %s1855_s2 = inlined_call_operand.hbm [shape: bf16[128,128], index: 2, kind: input, shape index: {}]   ;;  %s1856_s3 = inlined_call_operand.vmem [shape: f32[1,128], index: 3, kind: input, shape index: {}]   ;;  %s1857_s4 = inlined_call_operand.hbm [shape: bf16[128,128], index: 4, kind: input, shape index: {}]   ;;  %s1858_s5 = inlined_call_operand.vmem [shape: f32[1,128], index: 5, kind: input, shape index: {}]   ;;  %s1859_s6 = inlined_call_operand.hbm [shape: f32[2,4,128], index: 6, kind: output, shape index: {0}]   ;;  %s1860_s7 = inlined_call_operand.hbm [shape: f32[2,8,4,128], index: 7, kind: output, shape index: {1}]  }
   0x1   :  { %14 = vsyncpa [#allocation6], 0 }
   0x2   :  { %15 = vsyncpa [#allocation9], 0 }
   0x3   :  { %16 = vsyncpa [#allocation4], 0 }
   0x4   :  { %17 = vsyncpa [#allocation12], 0  ;;  %s1536_s24 = smov [#allocation5]   ;;  %s1537_s26 = smov [#allocation2]  }
   0x5   :  { %s36_s25 = sshll.u32 %s1536_s24, 4  ;;  %s23_s27 = sshll.u32 %s1537_s26, 4  ;;  %s37_s25 = int_to_ptr.vmem [resolvable:$true] %s36_s25  ;;  %s1587_s27 = int_to_ptr.vmem [resolvable:$true] %s23_s27 }
   0x6   :  { %s1394_s30 = scalar_lea.hbm %s1854_s1, 64 }
   0x7   :  { %p1395_p0 = scmp.ne.s32.totalorder %s1854_s1, %s1394_s30  ;;  %p1398_p1 = scmp.lt.u32.totalorder %s1394_s30, %s1854_s1 }
   0x9   :  { %p1400_p2 = pnand %p1398_p1, %p1395_p0 }
   0xb   :  { %1403 = shalt.err (!%p1400_p2)
}
   0xc   :  { %s1404_s12 = scalar_lea.vmem %s37_s25, 64  ;;  %p1409_p4 = scmp.lt.s32.totalorder %s37_s25, %s37_s25 }
   0xd   :  { %p1405_p3 = scmp.ne.s32.totalorder %s37_s25, %s1404_s12  ;;  %p1410_p5 = scmp.lt.s32.totalorder %s1404_s12, %s1404_s12 }
   0xf   :  { %p1411_p6 = por %p1410_p5, %p1409_p4 }
  0x11   :  { %p1412_p7 = pnand %p1411_p6, %p1405_p3 }
  0x13   :  { %1415 = shalt.err (!%p1412_p7)
}
  0x14   :  { %39 = dma.hbm_to_vmem [thread:$0]  %s1854_s1, 64, %s37_s25, [#allocation6]  }
  0x15   :  { %s1416_s17 = scalar_lea.hbm %s1853_s0, 256 }
  0x16   :  { %p1417_p8 = scmp.ne.s32.totalorder %s1853_s0, %s1416_s17  ;;  %p1420_p9 = scmp.lt.u32.totalorder %s1416_s17, %s1853_s0 }
  0x18   :  { %p1422_p10 = pnand %p1420_p9, %p1417_p8 }
  0x1a   :  { %1425 = shalt.err (!%p1422_p10)
}
  0x1b   :  { %s1426_s22 = scalar_lea.vmem %s1587_s27, 256  ;;  %p1431_p12 = scmp.lt.s32.totalorder %s1587_s27, %s1587_s27 }
  0x1c   :  { %p1427_p11 = scmp.ne.s32.totalorder %s1587_s27, %s1426_s22  ;;  %p1432_p13 = scmp.lt.s32.totalorder %s1426_s22, %s1426_s22 }
  0x1e   :  { %p1433_p0 = por %p1432_p13, %p1431_p12 }
  0x20   :  { %p1434_p1 = pnand %p1433_p0, %p1427_p11 }
  0x22   :  { %1437 = shalt.err (!%p1434_p1)
}
  0x23   :  { %s1538_s1 = smov 128   ;;  %s1539_s23 = smov 8  }
  0x24   :  { %29 = dma.hbm_to_vmem [thread:$0]  %s1853_s0, 256, %s1587_s27, [#allocation3], %s1538_s1, %s1538_s1, %s1539_s23  }
  0x25   :  { %s1540_s26 = smov [#allocation7]   ;;  %s1438_s8 = scalar_lea.hbm %s1855_s2, 1024 }
  0x26   :  { %s45_s28 = sshll.u32 %s1540_s26, 4  ;;  %p1439_p2 = scmp.ne.s32.totalorder %s1855_s2, %s1438_s8  ;;  %s46_s28 = int_to_ptr.vmem [resolvable:$true] %s45_s28 }
  0x27   :  { %p1442_p3 = scmp.lt.u32.totalorder %s1438_s8, %s1855_s2 }
  0x29   :  { %p1444_p4 = pnand %p1442_p3, %p1439_p2 }
  0x2b   :  { %1447 = shalt.err (!%p1444_p4)
}
  0x2c   :  { %s1448_s13 = scalar_lea.vmem %s46_s28, 1024  ;;  %p1453_p6 = scmp.lt.s32.totalorder %s46_s28, %s46_s28 }
  0x2d   :  { %p1449_p5 = scmp.ne.s32.totalorder %s46_s28, %s1448_s13  ;;  %p1454_p7 = scmp.lt.s32.totalorder %s1448_s13, %s1448_s13 }
  0x2f   :  { %p1455_p8 = por %p1454_p7, %p1453_p6 }
  0x31   :  { %p1456_p9 = pnand %p1455_p8, %p1449_p5 }
  0x33   :  { %1459 = shalt.err (!%p1456_p9)
}
  0x34   :  { %s1541_s0 = smov 64   ;;  %s1542_s27 = smov 4  }
  0x35   :  { %51 = dma.hbm_to_vmem [thread:$0]  %s1855_s2, 1024, %s46_s28, [#allocation6], %s1541_s0, %s1541_s0, %s1542_s27  }
  0x36   :  { %s1543_s16 = smov [#allocation8]   ;;  %s1460_s20 = scalar_lea.hbm %s1857_s4, 1024 }
  0x37   :  { %s59_s17 = sshll.u32 %s1543_s16, 4  ;;  %p1461_p10 = scmp.ne.s32.totalorder %s1857_s4, %s1460_s20  ;;  %s60_s17 = int_to_ptr.vmem [resolvable:$true] %s59_s17 }
  0x38   :  { %p1464_p11 = scmp.lt.u32.totalorder %s1460_s20, %s1857_s4 }
  0x3a   :  { %p1466_p12 = pnand %p1464_p11, %p1461_p10 }
  0x3c   :  { %1469 = shalt.err (!%p1466_p12)
}
  0x3d   :  { %s1470_s24 = scalar_lea.vmem %s60_s17, 1024  ;;  %p1475_p0 = scmp.lt.s32.totalorder %s60_s17, %s60_s17 }
  0x3e   :  { %p1471_p13 = scmp.ne.s32.totalorder %s60_s17, %s1470_s24  ;;  %p1476_p1 = scmp.lt.s32.totalorder %s1470_s24, %s1470_s24 }
  0x40   :  { %p1477_p2 = por %p1476_p1, %p1475_p0 }
  0x42   :  { %p1478_p3 = pnand %p1477_p2, %p1471_p13 }
  0x44   :  { %1481 = shalt.err (!%p1478_p3)
}
  0x45   :  { %65 = dma.hbm_to_vmem [thread:$0]  %s1857_s4, 1024, %s60_s17, [#allocation9], %s1541_s0, %s1541_s0, %s1542_s27  }
  0x46   :  { %1526 = dma.done.wait [#allocation3], 256  }
  0x47   :  { %1527 = vsyncadd [#allocation3], 4294967040 }
  0x48   :  { %1528 = dma.done.wait [#allocation6], 1088  }
  0x49   :  { %1529 = vsyncadd [#allocation6], 4294966208 }
  0x4a   :  { %1530 = dma.done.wait [#allocation9], 1024  }
  0x4b   :  { %1531 = vsyncadd [#allocation9], 4294966272  ;;  %v1544_v0 = vmov 1966171168   ;;  %v96_v2 = vlaneseq  ;;  %v1330_v3 = vld [vmem:[#allocation7] sm:$0xff]   ;;  %v1331_v4 = vld [vmem:[#allocation7 + $0x8] sm:$0xff]  }
  0x4c   :  { %v94_v1 = vunpack.c.l.s4 %v1544_v0  ;;  %1271 = vmatprep.subr.bf16.mxu0 %v1330_v3  ;;  %v1332_v7 = vld [vmem:[#allocation7 + $0x10] sm:$0xff]   ;;  %v1333_v9 = vld [vmem:[#allocation7 + $0x18] sm:$0xff]   ;;  %v1338_v16 = vld [vmem:[#allocation8] sm:$0xff]  }
  0x4d   :  { %v97_v6 = vshrl.u32 %v96_v2, 7  ;;  %1272 = vmatpush3.bf16.msra.mxu0 %v1330_v3  ;;  %v81_v11 = vld [vmem:[#allocation2] sm:$0xff]  ;;  %v82_v12 = vld [vmem:[#allocation2 + $0x8] sm:$0xff]  ;;  %1295 = vmatprep.subr.bf16.mxu1 %v1338_v16  ;;  %v1334_v21 = vld [vmem:[#allocation7 + $0x20] sm:$0xff]  }
  0x4e   :  { %v95_v5 = vunpack.c.0.s8 %v94_v1  ;;  %1273 = vmatprep.subr.bf16.mxu0 %v1331_v4  ;;  %v1196_v13 = vld.sshfl [vmem:[#allocation5] sm:$0x33 pattern:$0x75316420]  ;;  %v1339_v17 = vld [vmem:[#allocation8 + $0x8] sm:$0xff]   ;;  %1296 = vmatpush3.bf16.msra.mxu1 %v1338_v16  ;;  %v1340_v26 = vld [vmem:[#allocation8 + $0x10] sm:$0xff]  }
  0x4f   :  { %v111_v10 = vsub.s32 0, %v97_v6  ;;  %v92_v14 = vcombine.high %v1196_v13, %v1196_v13  ;;  %1297 = vmatprep.subr.bf16.mxu1 %v1339_v17  ;;  %v1335_v31 = vld [vmem:[#allocation7 + $0x28] sm:$0xff]   ;;  %v1341_v34 = vld [vmem:[#allocation8 + $0x18] sm:$0xff]   ;;  %v1336_v35 = vld [vmem:[#allocation7 + $0x30] sm:$0xff]  }
  0x50   :  { %v1648_v8 = vsub.s32 %v95_v5, %v97_v6  ;;  %v1342_v38 = vld [vmem:[#allocation8 + $0x20] sm:$0xff]   ;;  %v1337_v39 = vld [vmem:[#allocation7 + $0x38] sm:$0xff]   ;;  %v1343_v41 = vld [vmem:[#allocation8 + $0x28] sm:$0xff]  }
  0x51   :  { %1274 = vmatpush3.bf16.msra.mxu0 %v1331_v4  ;;  %v1344_v53 = vld [vmem:[#allocation8 + $0x30] sm:$0xff]   ;;  %v1345_v54 = vld [vmem:[#allocation8 + $0x38] sm:$0xff]   ;;  %v1197_v56 = vld [vmem:[%s1856_s3] ss:$0 sm:$0xff] }
  0x52   :  { %1275 = vmatprep.subr.bf16.mxu0 %v1332_v7  ;;  %v99_v15 = vrot.slane %v1196_v13, %v1648_v8  ;;  %v106_v20 = vrot.slane %v92_v14, %v1648_v8  ;;  %1298 = vmatpush3.bf16.msra.mxu1 %v1339_v17  ;;  %v1206_v13 = vld [vmem:[%s1858_s5] ss:$0 sm:$0xff]  ;;  %s1545_s5 = smov [#allocation11]  }
  0x53   :  { %1299 = vmatprep.subr.bf16.mxu1 %v1340_v26  ;;  %s1178_s29 = sshll.u32 %s1545_s5, 4  ;;  %s1816_s29 = int_to_ptr.vmem [resolvable:$true] %s1178_s29 }
  0x54   :  { %v107_v18 = vcombine.high %v99_v15, %v99_v15  ;;  %v112_v19 = vrot.slane %v99_v15, %v111_v10  ;;  %v116_v24 = vrot.slane %v106_v20, %v111_v10  ;;  %v108_v27 = vcombine.high %v106_v20, %v106_v20  ;;  %s1482_s30 = scalar_lea.vmem %s1816_s29, 1024  ;;  %p1487_p5 = scmp.lt.s32.totalorder %s1816_s29, %s1816_s29 }
  0x55   :  { %1276 = vmatpush3.bf16.msra.mxu0 %v1332_v7  ;;  %p1483_p4 = scmp.ne.s32.totalorder %s1816_s29, %s1482_s30  ;;  %p1488_p6 = scmp.lt.s32.totalorder %s1482_s30, %s1482_s30 }
  0x56   :  { %1277 = vmatprep.subr.bf16.mxu0 %v1333_v9  ;;  %v129_v22 = vmul.f32 %v112_v19, %v81_v11  ;;  %v130_v23 = vmul.f32 %v112_v19, %v82_v12  ;;  %v120_v25 = vrot.slane %v107_v18, %v111_v10  ;;  %v131_v28 = vmul.f32 %v116_v24, %v81_v11 }
  0x57   :  { %v132_v29 = vmul.f32 %v116_v24, %v82_v12  ;;  %v124_v33 = vrot.slane %v108_v27, %v111_v10  ;;  %1300 = vmatpush3.bf16.msra.mxu1 %v1340_v26  ;;  %p1489_p7 = por %p1488_p6, %p1487_p5 }
  0x58   :  { %1346 = vtanh.f32 %v129_v22  ;;  %v133_v30 = vmul.f32 %v120_v25, %v81_v11  ;;  %v134_v32 = vmul.f32 %v120_v25, %v82_v12  ;;  %1301 = vmatprep.subr.bf16.mxu1 %v1341_v34 }
  0x59   :  { %1278 = vmatpush3.bf16.msra.mxu0 %v1333_v9  ;;  %1348 = vtanh.f32 %v130_v23  ;;  %v135_v36 = vmul.f32 %v124_v33, %v81_v11  ;;  %v136_v37 = vmul.f32 %v124_v33, %v82_v12  ;;  %p1490_p8 = pnand %p1489_p7, %p1483_p4 }
  0x5a   :  { %1279 = vmatprep.subr.bf16.mxu0 %v1334_v21  ;;  %1350 = vtanh.f32 %v131_v28 }
  0x5b   :  { %1352 = vtanh.f32 %v132_v29  ;;  %1302 = vmatpush3.bf16.msra.mxu1 %v1341_v34 }
  0x5c   :  { %1354 = vtanh.f32 %v133_v30  ;;  %1303 = vmatprep.subr.bf16.mxu1 %v1342_v38 }
  0x5d   :  { %1280 = vmatpush3.bf16.msra.mxu0 %v1334_v21  ;;  %1356 = vtanh.f32 %v134_v32 }
  0x5e   :  { %1281 = vmatprep.subr.bf16.mxu0 %v1335_v31  ;;  %1358 = vtanh.f32 %v135_v36 }
  0x5f   :  { %1360 = vtanh.f32 %v136_v37  ;;  %1304 = vmatpush3.bf16.msra.mxu1 %v1342_v38 }
  0x60   :  { %1305 = vmatprep.subr.bf16.mxu1 %v1343_v41 }
  0x61   :  { %1282 = vmatpush3.bf16.msra.mxu0 %v1335_v31 }
  0x62   :  { %1283 = vmatprep.subr.bf16.mxu0 %v1336_v35  ;;  %v1347_v40 = vpop.eup %1346 }
  0x63   :  { %v1349_v42 = vpop.eup %1348  ;;  %1306 = vmatpush3.bf16.msra.mxu1 %v1343_v41 }
  0x64   :  { %v1351_v43 = vpop.eup %1350  ;;  %v145_v44 = vpack.c.bf16 %v1349_v42, %v1347_v40  ;;  %1307 = vmatprep.subr.bf16.mxu1 %v1344_v53 }
  0x65   :  { %1284 = vmatpush3.bf16.msra.mxu0 %v1336_v35  ;;  %v1353_v45 = vpop.eup %1352 }
  0x66   :  { %1285 = vmatprep.subr.bf16.mxu0 %v1337_v39  ;;  %v1355_v46 = vpop.eup %1354  ;;  %1287 = vmatprep.mubr.bf16.mxu0 %v145_v44  ;;  %v146_v48 = vpack.c.bf16 %v1353_v45, %v1351_v43 }
  0x67   :  { %v1357_v47 = vpop.eup %1356  ;;  %1308 = vmatpush3.bf16.msra.mxu1 %v1344_v53 }
  0x68   :  { %v147_v49 = vpack.c.bf16 %v1357_v47, %v1355_v46  ;;  %v1359_v50 = vpop.eup %1358  ;;  %1309 = vmatprep.subr.bf16.mxu1 %v1345_v54 }
  0x69   :  { %1286 = vmatpush3.bf16.msra.mxu0 %v1337_v39  ;;  %v1361_v51 = vpop.eup %1360 }
  0x6a   :  { %v148_v52 = vpack.c.bf16 %v1361_v51, %v1359_v50 }
  0x6b   :  { %1310 = vmatpush3.bf16.msra.mxu1 %v1345_v54 }
  0x6c   :  { %1288 = vmatmul.mubr.bf16.vlgmr.msra.gmra.mrb[0].mxu0 %v146_v48 }
  0x6d   :  { %1291 = vmatprep.mubr.bf16.mxu0 %v147_v49 }
  0x74   :  { %1292 = vmatmul.mubr.bf16.gmra.mrb[4].mxu0 %v148_v52 }
 0x13f   :  { %v1289_v55 = vpop.f32.mrb[0].mxu0 }
 0x140   :  { %v254_v57 = vpop.f32.mrb[1].mxu0  ;;  %v1661_v63 = vadd.f32 %v1289_v55, %v1197_v56 }
 0x141   :  { %v1290_v58 = vpop.f32.mrb[2].mxu0  ;;  %v1657_v61 = vadd.f32 %v1197_v56, %v254_v57 }
 0x142   :  { %v1655_v59 = vadd.f32 %v1290_v58, %v1197_v56  ;;  %v257_v60 = vpop.f32.mrb[3].mxu0 }
 0x143   :  { %v1659_v62 = vadd.f32 %v1197_v56, %v257_v60 }
 0x144   :  { %v286_v1 = vpack.c.bf16 %v1655_v59, %v1661_v63 }
 0x145   :  { %v285_v0 = vpack.c.bf16 %v1659_v62, %v1657_v61 }
 0x147   :  { %v1293_v2 = vpop.f32.mrb[4].mxu0  ;;  %1311 = vmatprep.mubr.bf16.mxu1 %v285_v0 }
 0x148   :  { %v270_v3 = vpop.f32.mrb[5].mxu0  ;;  %1312 = vmatmul.mubr.bf16.vlgmr.msra.gmra.mrb[0].mxu1 %v286_v1  ;;  %v1673_v10 = vadd.f32 %v1293_v2, %v1197_v56 }
 0x149   :  { %v1294_v4 = vpop.f32.mrb[6].mxu0  ;;  %v1669_v7 = vadd.f32 %v1197_v56, %v270_v3 }
 0x14a   :  { %v1667_v5 = vadd.f32 %v1294_v4, %v1197_v56  ;;  %v273_v6 = vpop.f32.mrb[7].mxu0 }
 0x14b   :  { %v1671_v9 = vadd.f32 %v1197_v56, %v273_v6 }
 0x14c   :  { %v288_v12 = vpack.c.bf16 %v1667_v5, %v1673_v10 }
 0x14d   :  { %v287_v11 = vpack.c.bf16 %v1671_v9, %v1669_v7 }
 0x14f   :  { %1315 = vmatprep.mubr.bf16.mxu1 %v287_v11 }
 0x150   :  { %1316 = vmatmul.mubr.bf16.gmra.mrb[4].mxu1 %v288_v12 }
 0x21b   :  { %v1313_v14 = vpop.f32.mrb[0].mxu1 }
 0x21c   :  { %v403_v15 = vadd.f32 %v1313_v14, %v1206_v13  ;;  %v394_v16 = vpop.f32.mrb[1].mxu1 }
 0x21d   :  { %v395_v17 = vadd.f32 %v1206_v13, %v394_v16  ;;  %v1314_v18 = vpop.f32.mrb[2].mxu1 }
 0x21e   :  { %v437_v19 = vrot.slane %v403_v15, 4  ;;  %v406_v20 = vadd.f32 %v1314_v18, %v1206_v13  ;;  %v397_v21 = vpop.f32.mrb[3].mxu1 }
 0x21f   :  { %v425_v22 = vrot.slane %v395_v17, 4  ;;  %v398_v23 = vadd.f32 %v1206_v13, %v397_v21 }
 0x220   :  { %v438_v24 = vmax.f32 %v403_v15, %v437_v19  ;;  %v443_v25 = vrot.slane %v406_v20, 4 }
 0x221   :  { %v426_v26 = vmax.f32 %v395_v17, %v425_v22  ;;  %v431_v27 = vrot.slane %v398_v23, 4 }
 0x222   :  { %v439_v28 = vrot.slane %v438_v24, 2  ;;  %v444_v29 = vmax.f32 %v406_v20, %v443_v25 }
 0x223   :  { %v427_v30 = vrot.slane %v426_v26, 2  ;;  %v432_v31 = vmax.f32 %v398_v23, %v431_v27  ;;  %v1317_v32 = vpop.f32.mrb[4].mxu1 }
 0x224   :  { %v440_v33 = vmax.f32 %v438_v24, %v439_v28  ;;  %v445_v34 = vrot.slane %v444_v29, 2  ;;  %v419_v35 = vadd.f32 %v1317_v32, %v1206_v13  ;;  %v410_v36 = vpop.f32.mrb[5].mxu1 }
 0x225   :  { %v428_v37 = vmax.f32 %v426_v26, %v427_v30  ;;  %v433_v38 = vrot.slane %v432_v31, 2  ;;  %v411_v39 = vadd.f32 %v1206_v13, %v410_v36  ;;  %v1318_v40 = vpop.f32.mrb[6].mxu1 }
 0x226   :  { %v441_v41 = vrot.slane %v440_v33, 1  ;;  %v446_v42 = vmax.f32 %v444_v29, %v445_v34  ;;  %v461_v43 = vrot.slane %v419_v35, 4  ;;  %v422_v44 = vadd.f32 %v1318_v40, %v1206_v13  ;;  %v413_v45 = vpop.f32.mrb[7].mxu1 }
 0x227   :  { %v429_v46 = vrot.slane %v428_v37, 1  ;;  %v434_v47 = vmax.f32 %v432_v31, %v433_v38  ;;  %v449_v48 = vrot.slane %v411_v39, 4  ;;  %v414_v49 = vadd.f32 %v1206_v13, %v413_v45 }
 0x228   :  { %v442_v50 = vmax.f32 %v440_v33, %v441_v41  ;;  %v447_v51 = vrot.slane %v446_v42, 1  ;;  %v462_v52 = vmax.f32 %v419_v35, %v461_v43  ;;  %v467_v53 = vrot.slane %v422_v44, 4 }
 0x229   :  { %v430_v54 = vmax.f32 %v428_v37, %v429_v46  ;;  %v435_v55 = vrot.slane %v434_v47, 1  ;;  %v450_v56 = vmax.f32 %v411_v39, %v449_v48  ;;  %v455_v57 = vrot.slane %v414_v49, 4 }
 0x22a   :  { %v475_v58 = vsub.f32 %v403_v15, %v442_v50  ;;  %v448_v60 = vmax.f32 %v446_v42, %v447_v51  ;;  %v463_v0 = vrot.slane %v462_v52, 2  ;;  %v468_v1 = vmax.f32 %v422_v44, %v467_v53 }
 0x22b   :  { %v473_v2 = vsub.f32 %v395_v17, %v430_v54  ;;  %v436_v3 = vmax.f32 %v434_v47, %v435_v55  ;;  %v451_v4 = vrot.slane %v450_v56, 2  ;;  %v456_v6 = vmax.f32 %v414_v49, %v455_v57 }
 0x22c   :  { %v485_v11 = vmul.f32 1.442695, %v475_v58  ;;  %v476_v12 = vsub.f32 %v406_v20, %v448_v60  ;;  %v464_v14 = vmax.f32 %v462_v52, %v463_v0  ;;  %v469_v13 = vrot.slane %v468_v1, 2 }
 0x22d   :  { %v481_v16 = vmul.f32 1.442695, %v473_v2  ;;  %v474_v18 = vsub.f32 %v398_v23, %v436_v3  ;;  %v452_v19 = vmax.f32 %v450_v56, %v451_v4  ;;  %v457_v21 = vrot.slane %v456_v6, 2 }
 0x22e   :  { %1362 = vpow2.f32 %v485_v11  ;;  %v487_v22 = vmul.f32 1.442695, %v476_v12  ;;  %v465_v24 = vrot.slane %v464_v14, 1  ;;  %v470_v25 = vmax.f32 %v468_v1, %v469_v13 }
 0x22f   :  { %1364 = vpow2.f32 %v481_v16  ;;  %v483_v15 = vmul.f32 1.442695, %v474_v18  ;;  %v453_v26 = vrot.slane %v452_v19, 1  ;;  %v458_v27 = vmax.f32 %v456_v6, %v457_v21 }
 0x230   :  { %1366 = vpow2.f32 %v487_v22  ;;  %v466_v17 = vmax.f32 %v464_v14, %v465_v24  ;;  %v471_v28 = vrot.slane %v470_v25, 1 }
 0x231   :  { %1368 = vpow2.f32 %v483_v15  ;;  %v454_v29 = vmax.f32 %v452_v19, %v453_v26  ;;  %v459_v20 = vrot.slane %v458_v27, 1 }
 0x232   :  { %v479_v30 = vsub.f32 %v419_v35, %v466_v17  ;;  %v472_v31 = vmax.f32 %v470_v25, %v471_v28 }
 0x233   :  { %v477_v32 = vsub.f32 %v411_v39, %v454_v29  ;;  %v460_v23 = vmax.f32 %v458_v27, %v459_v20 }
 0x234   :  { %v493_v33 = vmul.f32 1.442695, %v479_v30  ;;  %v480_v34 = vsub.f32 %v422_v44, %v472_v31 }
 0x235   :  { %v489_v36 = vmul.f32 1.442695, %v477_v32  ;;  %v478_v37 = vsub.f32 %v414_v49, %v460_v23 }
 0x236   :  { %1370 = vpow2.f32 %v493_v33  ;;  %v495_v38 = vmul.f32 1.442695, %v480_v34 }
 0x237   :  { %1372 = vpow2.f32 %v489_v36  ;;  %v491_v40 = vmul.f32 1.442695, %v478_v37 }
 0x238   :  { %v1682_v41 = vpop.eup %1362  ;;  %1374 = vpow2.f32 %v495_v38 }
 0x239   :  { %v1684_v42 = vpop.eup %1364  ;;  %v509_v43 = vrot.slane %v1682_v41, 4  ;;  %1376 = vpow2.f32 %v491_v40 }
 0x23a   :  { %v1687_v35 = vpop.eup %1366  ;;  %v497_v39 = vrot.slane %v1684_v42, 4 }
 0x23b   :  { %v1690_v45 = vpop.eup %1368  ;;  %v510_v44 = vadd.f32 %v1682_v41, %v509_v43  ;;  %v515_v46 = vrot.slane %v1687_v35, 4 }
 0x23c   :  { %v498_v47 = vadd.f32 %v1684_v42, %v497_v39  ;;  %v503_v48 = vrot.slane %v1690_v45, 4 }
 0x23d   :  { %v511_v49 = vrot.slane %v510_v44, 2  ;;  %v516_v50 = vadd.f32 %v1687_v35, %v515_v46 }
 0x23e   :  { %v499_v51 = vrot.slane %v498_v47, 2  ;;  %v504_v52 = vadd.f32 %v1690_v45, %v503_v48 }
 0x23f   :  { %v512_v53 = vadd.f32 %v511_v49, %v510_v44  ;;  %v517_v54 = vrot.slane %v516_v50, 2 }
 0x240   :  { %v1698_v55 = vpop.eup %1370  ;;  %v500_v56 = vadd.f32 %v499_v51, %v498_v47  ;;  %v505_v57 = vrot.slane %v504_v52, 2 }
 0x241   :  { %v1700_v58 = vpop.eup %1372  ;;  %v513_v60 = vrot.slane %v512_v53, 1  ;;  %v518_v0 = vadd.f32 %v517_v54, %v516_v50  ;;  %v533_v1 = vrot.slane %v1698_v55, 4 }
 0x242   :  { %v1703_v2 = vpop.eup %1374  ;;  %v501_v3 = vrot.slane %v500_v56, 1  ;;  %v506_v4 = vadd.f32 %v505_v57, %v504_v52  ;;  %v521_v6 = vrot.slane %v1700_v58, 4 }
 0x243   :  { %v1706_v11 = vpop.eup %1376  ;;  %v514_v12 = vadd.f32 %v513_v60, %v512_v53  ;;  %v519_v14 = vrot.slane %v518_v0, 1  ;;  %v534_v13 = vadd.f32 %v1698_v55, %v533_v1  ;;  %v539_v16 = vrot.slane %v1703_v2, 4 }
 0x244   :  { %v502_v18 = vadd.f32 %v501_v3, %v500_v56  ;;  %v507_v19 = vrot.slane %v506_v4, 1  ;;  %v522_v21 = vadd.f32 %v1700_v58, %v521_v6  ;;  %v527_v22 = vrot.slane %v1706_v11, 4 }
 0x245   :  { %1378 = vrcp.f32 %v514_v12  ;;  %v520_v24 = vadd.f32 %v519_v14, %v518_v0  ;;  %v535_v25 = vrot.slane %v534_v13, 2  ;;  %v540_v15 = vadd.f32 %v1703_v2, %v539_v16 }
 0x246   :  { %1380 = vrcp.f32 %v502_v18  ;;  %v508_v26 = vadd.f32 %v507_v19, %v506_v4  ;;  %v523_v27 = vrot.slane %v522_v21, 2  ;;  %v528_v17 = vadd.f32 %v1706_v11, %v527_v22 }
 0x247   :  { %1382 = vrcp.f32 %v520_v24  ;;  %v536_v28 = vadd.f32 %v535_v25, %v534_v13  ;;  %v541_v29 = vrot.slane %v540_v15, 2 }
 0x248   :  { %1384 = vrcp.f32 %v508_v26  ;;  %v524_v20 = vadd.f32 %v523_v27, %v522_v21  ;;  %v529_v30 = vrot.slane %v528_v17, 2 }
 0x249   :  { %v537_v31 = vrot.slane %v536_v28, 1  ;;  %v542_v32 = vadd.f32 %v541_v29, %v540_v15 }
 0x24a   :  { %v525_v23 = vrot.slane %v524_v20, 1  ;;  %v530_v33 = vadd.f32 %v529_v30, %v528_v17 }
 0x24b   :  { %v538_v34 = vadd.f32 %v537_v31, %v536_v28  ;;  %v543_v36 = vrot.slane %v542_v32, 1 }
 0x24c   :  { %v526_v37 = vadd.f32 %v525_v23, %v524_v20  ;;  %v531_v38 = vrot.slane %v530_v33, 1 }
 0x24d   :  { %v544_v40 = vadd.f32 %v543_v36, %v542_v32  ;;  %1386 = vrcp.f32 %v538_v34 }
 0x24e   :  { %v532_v43 = vadd.f32 %v531_v38, %v530_v33  ;;  %1388 = vrcp.f32 %v526_v37 }
 0x24f   :  { %v1379_v39 = vpop.eup %1378  ;;  %1390 = vrcp.f32 %v544_v40 }
 0x250   :  { %v1381_v44 = vpop.eup %1380  ;;  %v555_v46 = vmul.f32 %v1379_v39, %v1682_v41  ;;  %1392 = vrcp.f32 %v532_v43 }
 0x251   :  { %v1383_v47 = vpop.eup %1382  ;;  %v553_v48 = vmul.f32 %v1381_v44, %v1684_v42 }
 0x252   :  { %v1385_v49 = vpop.eup %1384  ;;  %v763_v50 = vcombine.high %v555_v46, %v555_v46  ;;  %v770_v51 = vrot.slane %v555_v46, %v1648_v8  ;;  %v1718_v52 = vmul.f32 %v1383_v47, %v1687_v35  ;;  %v1721_v53 = vmul.f32 %v555_v46, %v1661_v63 }
 0x253   :  { %v629_v54 = vcombine.high %v553_v48, %v553_v48  ;;  %v636_v56 = vrot.slane %v553_v48, %v1648_v8  ;;  %v1725_v41 = vmul.f32 %v1385_v49, %v1690_v45  ;;  %v1728_v57 = vmul.f32 %v553_v48, %v1657_v61 }
 0x254   :  { %v777_v42 = vrot.slane %v763_v50, %v1648_v8  ;;  %v778_v60 = vcombine.high %v770_v51, %v770_v51  ;;  %v786_v0 = vrot.slane %v770_v51, %v1648_v8  ;;  %1223 = vst.sshfl [vmem:[#allocation11 + $0x1] sm:$0x1 pattern:$0x73625140] %v770_v51  ;;  %v812_v35 = vcombine.high %v1718_v52, %v1718_v52 }
 0x255   :  { %v643_v63 = vrot.slane %v629_v54, %v1648_v8  ;;  %v644_v1 = vcombine.high %v636_v56, %v636_v56  ;;  %v652_v3 = vrot.slane %v636_v56, %v1648_v8  ;;  %1215 = vst.sshfl [vmem:[#allocation11] sm:$0x1 pattern:$0x73625140] %v636_v56  ;;  %v819_v45 = vrot.slane %v1718_v52, %v1648_v8 }
 0x256   :  { %v779_v61 = vcombine.high %v777_v42, %v777_v42  ;;  %v793_v4 = vrot.slane %v777_v42, %v1648_v8  ;;  %v800_v6 = vrot.slane %v778_v60, %v1648_v8  ;;  %v808_v12 = vcombine.high %v786_v0, %v786_v0  ;;  %1224 = vst.sshfl [vmem:[#allocation11 + $0x5] sm:$0x1 pattern:$0x73625140] %v778_v60 }
 0x257   :  { %1225 = vst.sshfl [vmem:[#allocation11 + $0x11] sm:$0x1 pattern:$0x73625140] %v777_v42  ;;  %v645_v14 = vcombine.high %v643_v63, %v643_v63  ;;  %v659_v13 = vrot.slane %v643_v63, %v1648_v8  ;;  %v666_v16 = vrot.slane %v644_v1, %v1648_v8  ;;  %v674_v18 = vcombine.high %v652_v3, %v652_v3  ;;  %v1387_v19 = vpop.eup %1386 }
 0x258   :  { %1216 = vst.sshfl [vmem:[#allocation11 + $0x4] sm:$0x1 pattern:$0x73625140] %v644_v1  ;;  %v807_v21 = vrot.slane %v779_v61, %v1648_v8  ;;  %v809_v22 = vcombine.high %v793_v4, %v793_v4  ;;  %v810_v24 = vcombine.high %v800_v6, %v800_v6  ;;  %879 = vst [vmem:[#allocation11 + $0x9] sm:$0x1] %v808_v12  ;;  %v1389_v15 = vpop.eup %1388 }
 0x259   :  { %1217 = vst.sshfl [vmem:[#allocation11 + $0x10] sm:$0x1 pattern:$0x73625140] %v643_v63  ;;  %v826_v25 = vrot.slane %v812_v35, %v1648_v8  ;;  %v673_v26 = vrot.slane %v645_v14, %v1648_v8  ;;  %v675_v27 = vcombine.high %v659_v13, %v659_v13  ;;  %v676_v17 = vcombine.high %v666_v16, %v666_v16  ;;  %v1745_v29 = vpop.eup %1390 }
 0x25a   :  { %1227 = vst.sshfl [vmem:[#allocation11 + $0x21] sm:$0x1 pattern:$0x73625140] %v819_v45  ;;  %745 = vst [vmem:[#allocation11 + $0x8] sm:$0x1] %v674_v18  ;;  %v827_v28 = vcombine.high %v819_v45, %v819_v45  ;;  %v811_v20 = vcombine.high %v807_v21, %v807_v21  ;;  %v835_v31 = vrot.slane %v819_v45, %v1648_v8  ;;  %v1749_v23 = vpop.eup %1392 }
 0x25b   :  { %1226 = vst.sshfl [vmem:[#allocation11 + $0x15] sm:$0x1 pattern:$0x73625140] %v779_v61  ;;  %880 = vst [vmem:[#allocation11 + $0xd] sm:$0x1] %v810_v24  ;;  %v828_v30 = vcombine.high %v826_v25, %v826_v25  ;;  %v842_v32 = vrot.slane %v826_v25, %v1648_v8  ;;  %v677_v33 = vcombine.high %v673_v26, %v673_v26 }
 0x25c   :  { %1218 = vst.sshfl [vmem:[#allocation11 + $0x14] sm:$0x1 pattern:$0x73625140] %v645_v14  ;;  %883 = vst [vmem:[#allocation11 + $0x19] sm:$0x1] %v809_v22  ;;  %v849_v34 = vrot.slane %v827_v28, %v1648_v8  ;;  %v678_v36 = vcombine.high %v1725_v41, %v1725_v41  ;;  %v685_v37 = vrot.slane %v1725_v41, %v1648_v8 }
 0x25d   :  { %1229 = vst.sshfl [vmem:[#allocation11 + $0x31] sm:$0x1 pattern:$0x73625140] %v826_v25  ;;  %746 = vst [vmem:[#allocation11 + $0xc] sm:$0x1] %v676_v17  ;;  %v856_v38 = vrot.slane %v828_v30, %v1648_v8  ;;  %v857_v40 = vcombine.high %v835_v31, %v835_v31  ;;  %v858_v43 = vcombine.high %v842_v32, %v842_v32 }
 0x25e   :  { %749 = vst [vmem:[#allocation11 + $0x18] sm:$0x1] %v675_v27  ;;  %1228 = vst.sshfl [vmem:[#allocation11 + $0x25] sm:$0x1 pattern:$0x73625140] %v827_v28  ;;  %v1758_v39 = vmul.f32 %v1387_v19, %v1698_v55  ;;  %v859_v44 = vcombine.high %v849_v34, %v849_v34  ;;  %v692_v46 = vrot.slane %v678_v36, %v1648_v8 }
 0x25f   :  { %884 = vst [vmem:[#allocation11 + $0x1d] sm:$0x1] %v811_v20  ;;  %1230 = vst.sshfl [vmem:[#allocation11 + $0x35] sm:$0x1 pattern:$0x73625140] %v828_v30  ;;  %v693_v47 = vcombine.high %v685_v37, %v685_v37  ;;  %v701_v48 = vrot.slane %v685_v37, %v1648_v8  ;;  %v860_v49 = vcombine.high %v856_v38, %v856_v38 }
 0x260   :  { %750 = vst [vmem:[#allocation11 + $0x1c] sm:$0x1] %v677_v33  ;;  %1219 = vst.sshfl [vmem:[#allocation11 + $0x20] sm:$0x1 pattern:$0x73625140] %v685_v37  ;;  %v1031_v50 = vcombine.high %v1758_v39, %v1758_v39  ;;  %v1038_v51 = vrot.slane %v1758_v39, %v1648_v8  ;;  %v1767_v55 = vmul.f32 %v1389_v15, %v1700_v58 }
 0x261   :  { %887 = vst [vmem:[#allocation11 + $0x29] sm:$0x1] %v857_v40  ;;  %891 = vst [vmem:[#allocation11 + $0x39] sm:$0x1] %v858_v43  ;;  %v694_v54 = vcombine.high %v692_v46, %v692_v46  ;;  %v708_v56 = vrot.slane %v692_v46, %v1648_v8  ;;  %v715_v42 = vrot.slane %v693_v47, %v1648_v8 }
 0x262   :  { %888 = vst [vmem:[#allocation11 + $0x2d] sm:$0x1] %v859_v44  ;;  %v723_v60 = vcombine.high %v701_v48, %v701_v48  ;;  %1220 = vst.sshfl [vmem:[#allocation11 + $0x24] sm:$0x1 pattern:$0x73625140] %v693_v47  ;;  %v1045_v0 = vrot.slane %v1031_v50, %v1648_v8  ;;  %v1046_v35 = vcombine.high %v1038_v51, %v1038_v51 }
 0x263   :  { %1221 = vst.sshfl [vmem:[#allocation11 + $0x30] sm:$0x1 pattern:$0x73625140] %v692_v46  ;;  %892 = vst [vmem:[#allocation11 + $0x3d] sm:$0x1] %v860_v49  ;;  %v1054_v63 = vrot.slane %v1038_v51, %v1648_v8  ;;  %v897_v58 = vcombine.high %v1767_v55, %v1767_v55  ;;  %v722_v1 = vrot.slane %v694_v54, %v1648_v8 }
 0x264   :  { %1239 = vst.sshfl [vmem:[#allocation11 + $0x3] sm:$0x1 pattern:$0x73625140] %v1038_v51  ;;  %v724_v3 = vcombine.high %v708_v56, %v708_v56  ;;  %v725_v45 = vcombine.high %v715_v42, %v715_v42  ;;  %753 = vst [vmem:[#allocation11 + $0x28] sm:$0x1] %v723_v60  ;;  %v904_v61 = vrot.slane %v1767_v55, %v1648_v8 }
 0x265   :  { %1222 = vst.sshfl [vmem:[#allocation11 + $0x34] sm:$0x1 pattern:$0x73625140] %v694_v54  ;;  %v1047_v4 = vcombine.high %v1045_v0, %v1045_v0  ;;  %v1061_v6 = vrot.slane %v1045_v0, %v1648_v8  ;;  %v1068_v12 = vrot.slane %v1046_v35, %v1648_v8  ;;  %v1076_v14 = vcombine.high %v1054_v63, %v1054_v63 }
 0x266   :  { %1240 = vst.sshfl [vmem:[#allocation11 + $0x7] sm:$0x1 pattern:$0x73625140] %v1046_v35  ;;  %v726_v13 = vcombine.high %v722_v1, %v722_v1  ;;  %754 = vst [vmem:[#allocation11 + $0x2c] sm:$0x1] %v725_v45  ;;  %v911_v16 = vrot.slane %v897_v58, %v1648_v8  ;;  %v912_v18 = vcombine.high %v904_v61, %v904_v61 }
 0x267   :  { %1241 = vst.sshfl [vmem:[#allocation11 + $0x13] sm:$0x1 pattern:$0x73625140] %v1045_v0  ;;  %757 = vst [vmem:[#allocation11 + $0x38] sm:$0x1] %v724_v3  ;;  %v920_v19 = vrot.slane %v904_v61, %v1648_v8  ;;  %v1075_v21 = vrot.slane %v1047_v4, %v1648_v8  ;;  %v1077_v22 = vcombine.high %v1061_v6, %v1061_v6 }
 0x268   :  { %1231 = vst.sshfl [vmem:[#allocation11 + $0x2] sm:$0x1 pattern:$0x73625140] %v904_v61  ;;  %v1078_v24 = vcombine.high %v1068_v12, %v1068_v12  ;;  %1147 = vst [vmem:[#allocation11 + $0xb] sm:$0x1] %v1076_v14  ;;  %v560_v25 = vmul.f32 %v1745_v29, %v1703_v2  ;;  %v913_v15 = vcombine.high %v911_v16, %v911_v16 }
 0x269   :  { %1242 = vst.sshfl [vmem:[#allocation11 + $0x17] sm:$0x1 pattern:$0x73625140] %v1047_v4  ;;  %758 = vst [vmem:[#allocation11 + $0x3c] sm:$0x1] %v726_v13  ;;  %v927_v26 = vrot.slane %v911_v16, %v1648_v8  ;;  %v934_v27 = vrot.slane %v912_v18, %v1648_v8  ;;  %v942_v17 = vcombine.high %v920_v19, %v920_v19 }
 0x26a   :  { %1232 = vst.sshfl [vmem:[#allocation11 + $0x6] sm:$0x1 pattern:$0x73625140] %v912_v18  ;;  %v1079_v28 = vcombine.high %v1075_v21, %v1075_v21  ;;  %1148 = vst [vmem:[#allocation11 + $0xf] sm:$0x1] %v1078_v24  ;;  %v1080_v20 = vcombine.high %v560_v25, %v560_v25  ;;  %v1087_v30 = vrot.slane %v560_v25, %v1648_v8 }
 0x26b   :  { %1233 = vst.sshfl [vmem:[#allocation11 + $0x12] sm:$0x1 pattern:$0x73625140] %v911_v16  ;;  %1151 = vst [vmem:[#allocation11 + $0x1b] sm:$0x1] %v1077_v22  ;;  %v558_v31 = vmul.f32 %v1749_v23, %v1706_v11  ;;  %v941_v2 = vrot.slane %v913_v15, %v1648_v8  ;;  %v943_v29 = vcombine.high %v927_v26, %v927_v26 }
 0x26c   :  { %v944_v32 = vcombine.high %v934_v27, %v934_v27  ;;  %1013 = vst [vmem:[#allocation11 + $0xa] sm:$0x1] %v942_v17  ;;  %1234 = vst.sshfl [vmem:[#allocation11 + $0x16] sm:$0x1 pattern:$0x73625140] %v913_v15  ;;  %v562_v33 = vmul.f32 %v1725_v41, %v1659_v62  ;;  %v1094_v34 = vrot.slane %v1080_v20, %v1648_v8 }
 0x26d   :  { %1152 = vst [vmem:[#allocation11 + $0x1f] sm:$0x1] %v1079_v28  ;;  %v1095_v36 = vcombine.high %v1087_v30, %v1087_v30  ;;  %v1103_v37 = vrot.slane %v1087_v30, %v1648_v8  ;;  %1243 = vst.sshfl [vmem:[#allocation11 + $0x23] sm:$0x1 pattern:$0x73625140] %v1087_v30  ;;  %v946_v38 = vcombine.high %v558_v31, %v558_v31 }
 0x26e   :  { %v945_v40 = vcombine.high %v941_v2, %v941_v2  ;;  %1014 = vst [vmem:[#allocation11 + $0xe] sm:$0x1] %v944_v32  ;;  %1017 = vst [vmem:[#allocation11 + $0x1a] sm:$0x1] %v943_v29  ;;  %v953_v11 = vrot.slane %v558_v31, %v1648_v8  ;;  %v564_v23 = vmul.f32 %v1718_v52, %v1655_v59  ;;  %v569_v0 = vrot.slane %v1728_v57, 4 }
 0x26f   :  { %v565_v43 = vmul.f32 %v1767_v55, %v1669_v7  ;;  %v1096_v62 = vcombine.high %v1094_v34, %v1094_v34  ;;  %v1110_v41 = vrot.slane %v1094_v34, %v1648_v8  ;;  %v1117_v44 = vrot.slane %v1095_v36, %v1648_v8  ;;  %1244 = vst.sshfl [vmem:[#allocation11 + $0x27] sm:$0x1 pattern:$0x73625140] %v1095_v36 }
 0x270   :  { %v1125_v46 = vcombine.high %v1103_v37, %v1103_v37  ;;  %1245 = vst.sshfl [vmem:[#allocation11 + $0x33] sm:$0x1 pattern:$0x73625140] %v1094_v34  ;;  %1018 = vst [vmem:[#allocation11 + $0x1e] sm:$0x1] %v945_v40  ;;  %v960_v47 = vrot.slane %v946_v38, %v1648_v8  ;;  %v961_v48 = vcombine.high %v953_v11, %v953_v11 }
 0x271   :  { %v969_v49 = vrot.slane %v953_v11, %v1648_v8  ;;  %1235 = vst.sshfl [vmem:[#allocation11 + $0x22] sm:$0x1 pattern:$0x73625140] %v953_v11  ;;  %v566_v59 = vmul.f32 %v558_v31, %v1671_v9  ;;  %v1124_v52 = vrot.slane %v1096_v62, %v1648_v8  ;;  %v1126_v7 = vcombine.high %v1110_v41, %v1110_v41 }
 0x272   :  { %v1127_v50 = vcombine.high %v1117_v44, %v1117_v44  ;;  %1155 = vst [vmem:[#allocation11 + $0x2b] sm:$0x1] %v1125_v46  ;;  %1246 = vst.sshfl [vmem:[#allocation11 + $0x37] sm:$0x1 pattern:$0x73625140] %v1096_v62  ;;  %v567_v51 = vmul.f32 %v1758_v39, %v1673_v10  ;;  %v962_v55 = vcombine.high %v960_v47, %v960_v47 }
 0x273   :  { %v976_v54 = vrot.slane %v960_v47, %v1648_v8  ;;  %v983_v56 = vrot.slane %v961_v48, %v1648_v8  ;;  %v991_v42 = vcombine.high %v969_v49, %v969_v49  ;;  %1236 = vst.sshfl [vmem:[#allocation11 + $0x26] sm:$0x1 pattern:$0x73625140] %v961_v48  ;;  %v1128_v60 = vcombine.high %v1124_v52, %v1124_v52 }
 0x274   :  { %1237 = vst.sshfl [vmem:[#allocation11 + $0x32] sm:$0x1 pattern:$0x73625140] %v960_v47  ;;  %1156 = vst [vmem:[#allocation11 + $0x2f] sm:$0x1] %v1127_v50  ;;  %v568_v9 = vmul.f32 %v560_v25, %v1667_v5  ;;  %v990_v10 = vrot.slane %v962_v55, %v1648_v8  ;;  %v570_v1 = vadd.f32 %v569_v0, %v1728_v57 }
 0x275   :  { %1159 = vst [vmem:[#allocation11 + $0x3b] sm:$0x1] %v1126_v7  ;;  %v575_v35 = vrot.slane %v562_v33, 4  ;;  %v992_v39 = vcombine.high %v976_v54, %v976_v54  ;;  %v993_v63 = vcombine.high %v983_v56, %v983_v56  ;;  %1021 = vst [vmem:[#allocation11 + $0x2a] sm:$0x1] %v991_v42  ;;  %v581_v58 = vrot.slane %v1721_v53, 4 }
 0x276   :  { %1238 = vst.sshfl [vmem:[#allocation11 + $0x36] sm:$0x1 pattern:$0x73625140] %v962_v55  ;;  %1160 = vst [vmem:[#allocation11 + $0x3f] sm:$0x1] %v1128_v60  ;;  %v994_v5 = vcombine.high %v990_v10, %v990_v10 }
 0x277   :  { %v576_v3 = vadd.f32 %v575_v35, %v562_v33  ;;  %v587_v45 = vrot.slane %v564_v23, 4  ;;  %v593_v61 = vrot.slane %v565_v43, 4  ;;  %1022 = vst [vmem:[#allocation11 + $0x2e] sm:$0x1] %v993_v63  ;;  %1025 = vst [vmem:[#allocation11 + $0x3a] sm:$0x1] %v992_v39  ;;  %v582_v4 = vadd.f32 %v581_v58, %v1721_v53 }
 0x278   :  { %v599_v6 = vrot.slane %v566_v59, 4  ;;  %v605_v12 = vrot.slane %v567_v51, 4  ;;  %v571_v8 = vrot.slane %v570_v1, 2  ;;  %1026 = vst [vmem:[#allocation11 + $0x3e] sm:$0x1] %v994_v5  ;;  %v611_v21 = vrot.slane %v568_v9, 4 }
 0x279   :  { %v577_v14 = vrot.slane %v576_v3, 2  ;;  %v588_v13 = vadd.f32 %v587_v45, %v564_v23  ;;  %v594_v16 = vadd.f32 %v593_v61, %v565_v43  ;;  %v583_v57 = vrot.slane %v582_v4, 2 }
 0x27a   :  { %v600_v18 = vadd.f32 %v599_v6, %v566_v59  ;;  %v606_v19 = vadd.f32 %v605_v12, %v567_v51  ;;  %v572_v22 = vadd.f32 %v571_v8, %v570_v1 }
 0x27b   :  { %v578_v24 = vadd.f32 %v577_v14, %v576_v3  ;;  %v589_v25 = vrot.slane %v588_v13, 2  ;;  %v595_v53 = vrot.slane %v594_v16, 2 }
 0x27c   :  { %1493 = shalt.err (!%p1490_p8)
}
 0x27d   :  { %s1494_s10 = scalar_lea.hbm %s1860_s7, 1024 }
 0x27e   :  { %p1495_p9 = scmp.ne.s32.totalorder %s1860_s7, %s1494_s10  ;;  %p1498_p10 = scmp.lt.u32.totalorder %s1494_s10, %s1860_s7 }
 0x280   :  { %p1500_p11 = pnand %p1498_p10, %p1495_p9 }
 0x282   :  { %1503 = shalt.err (!%p1500_p11)
}
 0x283   :  { %1184 = dma.vmem_to_hbm [thread:$0]  %s1816_s29, 1024, %s1860_s7, [#allocation12], %s1541_s0, %s1541_s0, %s1542_s27   ;;  %v584_v15 = vadd.f32 %v583_v57, %v582_v4  ;;  %v601_v26 = vrot.slane %v600_v18, 2  ;;  %v607_v27 = vrot.slane %v606_v19, 2  ;;  %v612_v17 = vadd.f32 %v611_v21, %v568_v9 }
 0x284   :  { %v573_v28 = vrot.slane %v572_v22, 1  ;;  %v579_v20 = vrot.slane %v578_v24, 1  ;;  %v590_v30 = vadd.f32 %v589_v25, %v588_v13  ;;  %v596_v31 = vadd.f32 %v595_v53, %v594_v16  ;;  %s1546_s7 = smov [#allocation10]  }
 0x285   :  { %v585_v2 = vrot.slane %v584_v15, 1  ;;  %v602_v29 = vadd.f32 %v601_v26, %v600_v18  ;;  %v608_v32 = vadd.f32 %v607_v27, %v606_v19  ;;  %v613_v33 = vrot.slane %v612_v17, 2  ;;  %s1166_s17 = sshll.u32 %s1546_s7, 4  ;;  %s1167_s17 = int_to_ptr.vmem [resolvable:$true] %s1166_s17 }
 0x286   :  { %v574_v34 = vadd.f32 %v573_v28, %v572_v22  ;;  %v580_v36 = vadd.f32 %v579_v20, %v578_v24  ;;  %v591_v37 = vrot.slane %v590_v30, 1  ;;  %v597_v38 = vrot.slane %v596_v31, 1  ;;  %s1504_s18 = scalar_lea.vmem %s1167_s17, 128  ;;  %p1509_p13 = scmp.lt.s32.totalorder %s1167_s17, %s1167_s17 }
 0x287   :  { %v586_v40 = vadd.f32 %v585_v2, %v584_v15  ;;  %v603_v11 = vrot.slane %v602_v29, 1  ;;  %v609_v23 = vrot.slane %v608_v32, 1  ;;  %v614_v43 = vadd.f32 %v613_v33, %v612_v17  ;;  %p1505_p12 = scmp.ne.s32.totalorder %s1167_s17, %s1504_s18  ;;  %p1510_p0 = scmp.lt.s32.totalorder %s1504_s18, %s1504_s18 }
 0x288   :  { %v592_v62 = vadd.f32 %v591_v37, %v590_v30  ;;  %v598_v41 = vadd.f32 %v597_v38, %v596_v31  ;;  %v617_v44 = vmul.f32 0.125, %v574_v34  ;;  %v618_v46 = vmul.f32 0.125, %v580_v36 }
 0x289   :  { %v604_v47 = vadd.f32 %v603_v11, %v602_v29  ;;  %v610_v48 = vadd.f32 %v609_v23, %v608_v32  ;;  %v615_v49 = vrot.slane %v614_v43, 1  ;;  %v619_v59 = vmul.f32 0.125, %v586_v40  ;;  %p1511_p1 = por %p1510_p0, %p1509_p13 }
 0x28a   :  { %v620_v52 = vmul.f32 0.125, %v592_v62  ;;  %v621_v7 = vmul.f32 0.125, %v598_v41  ;;  %625 = vst [vmem:[#allocation10] sm:$0x1] %v617_v44  ;;  %626 = vst [vmem:[#allocation10 + $0x4] sm:$0x1] %v618_v46 }
 0x28b   :  { %v616_v50 = vadd.f32 %v615_v49, %v614_v43  ;;  %v622_v51 = vmul.f32 0.125, %v604_v47  ;;  %v623_v55 = vmul.f32 0.125, %v610_v48  ;;  %759 = vst [vmem:[#allocation10 + $0x1] sm:$0x1] %v619_v59  ;;  %p1512_p2 = pnand %p1511_p1, %p1505_p12 }
 0x28c   :  { %760 = vst [vmem:[#allocation10 + $0x5] sm:$0x1] %v620_v52  ;;  %893 = vst [vmem:[#allocation10 + $0x2] sm:$0x1] %v621_v7 }
 0x28d   :  { %v624_v54 = vmul.f32 0.125, %v616_v50  ;;  %894 = vst [vmem:[#allocation10 + $0x6] sm:$0x1] %v622_v51  ;;  %1027 = vst [vmem:[#allocation10 + $0x3] sm:$0x1] %v623_v55 }
 0x28f   :  { %1028 = vst [vmem:[#allocation10 + $0x7] sm:$0x1] %v624_v54 }
 0x290   :  { %1515 = shalt.err (!%p1512_p2)
}
 0x291   :  { %s1516_s21 = scalar_lea.hbm %s1859_s6, 128 }
 0x292   :  { %p1517_p3 = scmp.ne.s32.totalorder %s1859_s6, %s1516_s21  ;;  %p1520_p4 = scmp.lt.u32.totalorder %s1516_s21, %s1859_s6 }
 0x294   :  { %p1522_p5 = pnand %p1520_p4, %p1517_p3 }
 0x296   :  { %1525 = shalt.err (!%p1522_p5)
}
 0x297   :  { %1172 = dma.vmem_to_hbm [thread:$0]  %s1167_s17, 128, %s1859_s6, [#allocation4], %s1541_s0, %s1541_s0, %s1542_s27  }
 0x298   :  { %1532 = dma.done.wait [#allocation4], 128  }
 0x299   :  { %1533 = vsyncadd [#allocation4], 4294967168 }
 0x29a   :  { %1534 = dma.done.wait [#allocation12], 1024  }
 0x29b   :  { %1535 = vsyncadd [#allocation12], 4294966272 }
 0x29c   :  { %1191 = vsyncpa [#allocation3], 1 }
 0x29d   :  { %1192 = vsyncpa [#allocation6], 1 }
 0x29e   :  { %1193 = vsyncpa [#allocation9], 1 }
 0x29f   :  { %1194 = vsyncpa [#allocation4], 1 }
 0x2a0   :  { %1195 = vsyncpa [#allocation12], 1 }

</bundles_post_ra>
